<compile_context>
chip_gen: v7x
topology: tpu7x:2x2x1
jax: 0.10.0
libtpu: 0.0.40
codegen_flags: <defaults>
</compile_context>

<pallas_src>
import functools

import jax
import jax.numpy as jnp
from jax.experimental import pallas as pl
from jax.experimental.pallas import tpu as pltpu


# ----------------------------- fused Pallas kernel -----------------------------

def _log_softmax(v):
    v = v - jnp.max(v, axis=-1, keepdims=True)
    return v - jnp.log(jnp.sum(jnp.exp(v), axis=-1, keepdims=True))


def _fused_loss_kernel(out1_ref, out2_ref, labels_ref, x_ref, w_ref, b_ref,
                       res_ref, *, alpha, beta, tau, distill_type):
    B, C = out1_ref.shape

    x1 = out1_ref[...].astype(jnp.float32)
    x2 = out2_ref[...].astype(jnp.float32)
    y = labels_ref[...].astype(jnp.float32)

    # ---------------- base criterion: softCE ----------------
    #   loss = mean_b( -sum_c (y / sum(y)) * log_softmax(x) )
    # (divide replaced by per-row EUP reciprocal; -sum(y*logp) * (1/sum(y)))
    inv_ysum = pl.reciprocal(jnp.sum(y, axis=-1, keepdims=True), approx=True)  # [B,1]
    lp1 = _log_softmax(x1)
    lp2 = _log_softmax(x2)
    l1 = jnp.sum(-jnp.sum(y * lp1, axis=-1, keepdims=True) * inv_ysum) * (1.0 / B)
    l2 = jnp.sum(-jnp.sum(y * lp2, axis=-1, keepdims=True) * inv_ysum) * (1.0 / B)
    base_loss = 0.5 * (l1 + l2)

    # alpha == 0.0 path of the PyTorch module: no 'feat' distillation term.
    loss = (1.0 - alpha) * base_loss
    distill = jnp.float32(0.0)

    if beta > 0.0:
        # -------- teacher linear head: bf16 operands, f32 MXU accumulate --------
        t = jnp.dot(x_ref[...].astype(jnp.bfloat16), w_ref[...],
                    preferred_element_type=jnp.float32)
        t = t + b_ref[...].astype(jnp.float32)
        # Split the two teacher heads in-kernel (lane-aligned static slices);
        # teacher logits never leave VMEM.  .detach() is implicit (forward-only,
        # teacher params are constants).
        t1 = t[:, :C]
        t2 = t[:, C:]

        if distill_type == 'logits_kl':
            # F.kl_div(log_softmax(s/T), log_softmax(t/T), 'sum', log_target=True) * T*T / numel
            scale = tau * tau / (B * C)

            def kl(s, tt):
                zs = s * (1.0 / tau)
                zs = zs - jnp.max(zs, axis=-1, keepdims=True)
                lp = zs - jnp.log(jnp.sum(jnp.exp(zs), axis=-1, keepdims=True))
                zt = tt * (1.0 / tau)
                zt = zt - jnp.max(zt, axis=-1, keepdims=True)
                et = jnp.exp(zt)                               # reused: lse AND exp(lq)
                sum_et = jnp.sum(et, axis=-1, keepdims=True)
                lq = zt - jnp.log(sum_et)
                q = et * pl.reciprocal(sum_et, approx=True)    # exp(lq) without a 2nd exp
                return jnp.sum(q * (lq - lp)) * scale

            d1 = kl(x1, t1)
            d2 = kl(x2, t2)
        else:  # 'logits' -> soft CE against softmax(teacher); reuse student log-probs
            def ce(lp, tt):
                zt = tt - jnp.max(tt, axis=-1, keepdims=True)
                et = jnp.exp(zt)
                q = et * pl.reciprocal(jnp.sum(et, axis=-1, keepdims=True), approx=True)
                return jnp.sum(-q * lp) * (1.0 / B)

            d1 = ce(lp1, t1)
            d2 = ce(lp2, t2)

        distill = 0.5 * (d1 + d2)
        loss = (1.0 - beta) * loss + beta * distill

    # Scalar outputs straight to SMEM (no masked (1,1) VMEM writebacks).
    res_ref[0] = loss
    res_ref[1] = distill


# ----------------------------- wrapper -----------------------------

_VMEM = pl.BlockSpec(memory_space=pltpu.MemorySpace.VMEM)
_SMEM = pl.BlockSpec(memory_space=pltpu.MemorySpace.SMEM)


class PretrainSentLossPallas:
    """Mirror of PretrainSentLoss.forward for the tuple-outputs (two heads) path."""

    def __init__(self, *, loss_type='softCE', distill_type='logits_kl',
                 alpha=0.0, beta=0.4, tau=2.0,
                 num_classes=128, teacher_in_features=768):
        assert distill_type in ['none', 'feat', 'logits', 'logits_kl']
        if beta > 0:
            assert distill_type.startswith('logits')
        self.loss_type = loss_type
        self.distill_type = distill_type
        self.alpha = float(alpha)
        self.beta = float(beta)
        self.tau = float(tau)
        # Deterministic synthetic teacher parameters, stored in bf16: halves the dominant
        # weight DMA and keeps the MXU single-pass; f32 accumulation, teacher is no-grad.
        wk, bk = jax.random.split(jax.random.PRNGKey(42))
        self.teacher_w = (0.02 * jax.random.normal(
            wk, (teacher_in_features, 2 * num_classes), jnp.float32)).astype(jnp.bfloat16)
        self.teacher_b = (0.01 * jax.random.normal(
            bk, (1, 2 * num_classes), jnp.float32)).astype(jnp.bfloat16)

    def __call__(self, inputs, outputs, labels):
        # tuple-outputs path, alpha == 0.0 (no 'feat' term).
        outputs1, outputs2 = outputs
        B = inputs.shape[0]
        x_flat = inputs.reshape(B, -1)     # NCHW -> [B, C*H*W]; matches torch.flatten(x, 1)

        kernel = functools.partial(
            _fused_loss_kernel, alpha=self.alpha, beta=self.beta, tau=self.tau,
            distill_type=self.distill_type)
        res = pl.pallas_call(
            kernel,
            out_shape=jax.ShapeDtypeStruct((2,), jnp.float32),
            in_specs=[_VMEM] * 6,
            out_specs=_SMEM,
        )(outputs1, outputs2, labels, x_flat, self.teacher_w, self.teacher_b)
        return res[0], res[1]


# ----------------------------- reference (plain JAX) -----------------------------

def _ref_forward(module, inputs, outputs, labels):
    def log_softmax(x):
        x = x - jnp.max(x, axis=-1, keepdims=True)
        return x - jnp.log(jnp.sum(jnp.exp(x), axis=-1, keepdims=True))

    def soft_ce(x, y):
        t = y / jnp.sum(y, axis=-1, keepdims=True)
        return jnp.mean(-jnp.sum(t * log_softmax(x), axis=-1))

    def kl(s, t, T):
        lp, lq = log_softmax(s / T), log_softmax(t / T)
        return jnp.sum(jnp.exp(lq) * (lq - lp)) * (T * T) / s.size

    o1, o2 = outputs
    base = (soft_ce(o1, labels) + soft_ce(o2, labels)) / 2.0
    loss = (1.0 - module.alpha) * base
    distill = 0.0
    if module.beta > 0:
        B = inputs.shape[0]
        t = jnp.dot(inputs.reshape(B, -1).astype(jnp.bfloat16), module.teacher_w,
                    preferred_element_type=jnp.float32) + module.teacher_b.astype(jnp.float32)
        C = t.shape[1] // 2
        t1, t2 = t[:, :C], t[:, C:]
        if module.distill_type == 'logits_kl':
            distill = (kl(o1, t1, module.tau) + kl(o2, t2, module.tau)) / 2.0
        else:
            distill = (soft_ce(o1, jax.nn.softmax(t1, -1))
                       + soft_ce(o2, jax.nn.softmax(t2, -1))) / 2.0
        loss = (1.0 - module.beta) * loss + module.beta * distill
    return loss, distill


# ----------------------------- main -----------------------------

if __name__ == "__main__":
    B, Cimg, H, W = 8, 3, 16, 16          # teacher in_features = 3*16*16 = 768
    num_classes = 128

    key = jax.random.PRNGKey(0)
    k1, k2, k3, k4 = jax.random.split(key, 4)
    inputs = jax.random.normal(k1, (B, Cimg, H, W), jnp.float32)
    outputs1 = jax.random.normal(k2, (B, num_classes), jnp.float32)
    outputs2 = jax.random.normal(k3, (B, num_classes), jnp.float32)
    # soft labels; intentionally NOT normalized (forward normalizes for softCE)
    labels = 3.0 * jax.nn.softmax(jax.random.normal(k4, (B, num_classes)), axis=-1)

    module = PretrainSentLossPallas(
        loss_type='softCE', distill_type='logits_kl',
        alpha=0.0, beta=0.4, tau=2.0,
        num_classes=num_classes, teacher_in_features=Cimg * H * W)

    loss, distill = module(inputs, (outputs1, outputs2), labels)
    (loss, distill) = jax.block_until_ready((loss, distill))

    ref_loss, ref_distill = _ref_forward(module, inputs, (outputs1, outputs2), labels)
    assert jnp.allclose(loss, ref_loss, rtol=2e-2, atol=2e-3), (loss, ref_loss)
    assert jnp.allclose(distill, ref_distill, rtol=2e-2, atol=2e-3), (distill, ref_distill)

    print("KERNEL_OK")
</pallas_src>

<mosaic_0001>
module attributes {stable_mosaic.version = 11 : i64} {
  func.func @_fused_loss_kernel(%arg0: memref<8x128xf32, #tpu.memory_space<vmem>>, %arg1: memref<8x128xf32, #tpu.memory_space<vmem>>, %arg2: memref<8x128xf32, #tpu.memory_space<vmem>>, %arg3: memref<8x768xf32, #tpu.memory_space<vmem>>, %arg4: memref<768x256xbf16, #tpu.memory_space<vmem>>, %arg5: memref<1x256xbf16, #tpu.memory_space<vmem>>, %arg6: memref<2xf32, #tpu.memory_space<smem>>) attributes {dimension_semantics = [], scalar_prefetch = 0 : i64, scratch_operands = 0 : i64, tpu.core_type = #tpu.core_type<tc>} {
    %c0 = arith.constant 0 : index
    %c0_0 = arith.constant 0 : index
    %0 = vector.load %arg0[%c0, %c0_0] : memref<8x128xf32, #tpu.memory_space<vmem>>, vector<8x128xf32>
    %c0_1 = arith.constant 0 : index
    %c0_2 = arith.constant 0 : index
    %1 = vector.load %arg1[%c0_1, %c0_2] : memref<8x128xf32, #tpu.memory_space<vmem>>, vector<8x128xf32>
    %c0_3 = arith.constant 0 : index
    %c0_4 = arith.constant 0 : index
    %2 = vector.load %arg2[%c0_3, %c0_4] : memref<8x128xf32, #tpu.memory_space<vmem>>, vector<8x128xf32>
    %cst = arith.constant dense<0.000000e+00> : vector<8xf32>
    %3 = vector.multi_reduction <add>, %2, %cst [1] : vector<8x128xf32> to vector<8xf32>
    %4 = vector.shape_cast %3 : vector<8xf32> to vector<8x1xf32>
    %5 = tpu.reciprocal %4 {approx = true} : vector<8x1xf32> -> vector<8x1xf32>
    %cst_5 = arith.constant dense<0xFF800000> : vector<8xf32>
    %6 = vector.multi_reduction <maximumf>, %0, %cst_5 [1] : vector<8x128xf32> to vector<8xf32>
    %7 = vector.shape_cast %6 : vector<8xf32> to vector<8x1xf32>
    %8 = vector.broadcast %7 : vector<8x1xf32> to vector<8x128xf32>
    %9 = arith.subf %0, %8 : vector<8x128xf32>
    %10 = math.exp %9 : vector<8x128xf32>
    %cst_6 = arith.constant dense<0.000000e+00> : vector<8xf32>
    %11 = vector.multi_reduction <add>, %10, %cst_6 [1] : vector<8x128xf32> to vector<8xf32>
    %12 = vector.shape_cast %11 : vector<8xf32> to vector<8x1xf32>
    %13 = math.log %12 : vector<8x1xf32>
    %14 = vector.broadcast %13 : vector<8x1xf32> to vector<8x128xf32>
    %15 = arith.subf %9, %14 : vector<8x128xf32>
    %cst_7 = arith.constant dense<0xFF800000> : vector<8xf32>
    %16 = vector.multi_reduction <maximumf>, %1, %cst_7 [1] : vector<8x128xf32> to vector<8xf32>
    %17 = vector.shape_cast %16 : vector<8xf32> to vector<8x1xf32>
    %18 = vector.broadcast %17 : vector<8x1xf32> to vector<8x128xf32>
    %19 = arith.subf %1, %18 : vector<8x128xf32>
    %20 = math.exp %19 : vector<8x128xf32>
    %cst_8 = arith.constant dense<0.000000e+00> : vector<8xf32>
    %21 = vector.multi_reduction <add>, %20, %cst_8 [1] : vector<8x128xf32> to vector<8xf32>
    %22 = vector.shape_cast %21 : vector<8xf32> to vector<8x1xf32>
    %23 = math.log %22 : vector<8x1xf32>
    %24 = vector.broadcast %23 : vector<8x1xf32> to vector<8x128xf32>
    %25 = arith.subf %19, %24 : vector<8x128xf32>
    %26 = arith.mulf %2, %15 : vector<8x128xf32>
    %cst_9 = arith.constant dense<0.000000e+00> : vector<8xf32>
    %27 = vector.multi_reduction <add>, %26, %cst_9 [1] : vector<8x128xf32> to vector<8xf32>
    %28 = vector.shape_cast %27 : vector<8xf32> to vector<8x1xf32>
    %cst_10 = arith.constant 0.000000e+00 : f32
    %29 = vector.broadcast %cst_10 : f32 to vector<8x1xf32>
    %30 = arith.subf %29, %28 : vector<8x1xf32>
    %31 = arith.mulf %30, %5 : vector<8x1xf32>
    %32 = vector.shape_cast %31 : vector<8x1xf32> to vector<1x8x1xf32>
    %cst_11 = arith.constant dense<0.000000e+00> : vector<1xf32>
    %33 = vector.multi_reduction <add>, %32, %cst_11 [1, 2] : vector<1x8x1xf32> to vector<1xf32>
    %34 = vector.shape_cast %33 : vector<1xf32> to vector<1x1x1xf32>
    %35 = vector.extract %34[0, 0, 0] : f32 from vector<1x1x1xf32>
    %cst_12 = arith.constant 1.250000e-01 : f32
    %36 = arith.mulf %35, %cst_12 : f32
    %37 = arith.mulf %2, %25 : vector<8x128xf32>
    %cst_13 = arith.constant dense<0.000000e+00> : vector<8xf32>
    %38 = vector.multi_reduction <add>, %37, %cst_13 [1] : vector<8x128xf32> to vector<8xf32>
    %39 = vector.shape_cast %38 : vector<8xf32> to vector<8x1xf32>
    %cst_14 = arith.constant 0.000000e+00 : f32
    %40 = vector.broadcast %cst_14 : f32 to vector<8x1xf32>
    %41 = arith.subf %40, %39 : vector<8x1xf32>
    %42 = arith.mulf %41, %5 : vector<8x1xf32>
    %43 = vector.shape_cast %42 : vector<8x1xf32> to vector<1x8x1xf32>
    %cst_15 = arith.constant dense<0.000000e+00> : vector<1xf32>
    %44 = vector.multi_reduction <add>, %43, %cst_15 [1, 2] : vector<1x8x1xf32> to vector<1xf32>
    %45 = vector.shape_cast %44 : vector<1xf32> to vector<1x1x1xf32>
    %46 = vector.extract %45[0, 0, 0] : f32 from vector<1x1x1xf32>
    %cst_16 = arith.constant 1.250000e-01 : f32
    %47 = arith.mulf %46, %cst_16 : f32
    %48 = arith.addf %36, %47 : f32
    %cst_17 = arith.constant 5.000000e-01 : f32
    %49 = arith.mulf %cst_17, %48 : f32
    %cst_18 = arith.constant 1.000000e+00 : f32
    %50 = arith.mulf %cst_18, %49 : f32
    %c0_19 = arith.constant 0 : index
    %c0_20 = arith.constant 0 : index
    %51 = vector.load %arg3[%c0_19, %c0_20] : memref<8x768xf32, #tpu.memory_space<vmem>>, vector<8x768xf32>
    %52 = arith.truncf %51 : vector<8x768xf32> to vector<8x768xbf16>
    %c0_21 = arith.constant 0 : index
    %c0_22 = arith.constant 0 : index
    %53 = vector.load %arg4[%c0_21, %c0_22] : memref<768x256xbf16, #tpu.memory_space<vmem>>, vector<768x256xbf16>
    %cst_23 = arith.constant dense<0.000000e+00> : vector<8x256xf32>
    %54 = tpu.matmul %52, %53, %cst_23 {dimension_numbers = #tpu.dot_dimension_numbers<[1], [0], [0], [1], [0, 0, 1, 1], [], []>} : vector<8x768xbf16>, vector<768x256xbf16>, vector<8x256xf32> -> vector<8x256xf32>
    %c0_24 = arith.constant 0 : index
    %c0_25 = arith.constant 0 : index
    %55 = vector.load %arg5[%c0_24, %c0_25] : memref<1x256xbf16, #tpu.memory_space<vmem>>, vector<1x256xbf16>
    %56 = arith.extf %55 : vector<1x256xbf16> to vector<1x256xf32>
    %57 = vector.broadcast %56 : vector<1x256xf32> to vector<8x256xf32>
    %58 = arith.addf %54, %57 : vector<8x256xf32>
    %59 = vector.extract_strided_slice %58 {offsets = [0, 0], sizes = [8, 128], strides = [1, 1]} : vector<8x256xf32> to vector<8x128xf32>
    %60 = vector.extract_strided_slice %58 {offsets = [0, 128], sizes = [8, 128], strides = [1, 1]} : vector<8x256xf32> to vector<8x128xf32>
    %cst_26 = arith.constant 5.000000e-01 : f32
    %61 = vector.broadcast %cst_26 : f32 to vector<8x128xf32>
    %62 = arith.mulf %0, %61 : vector<8x128xf32>
    %cst_27 = arith.constant dense<0xFF800000> : vector<8xf32>
    %63 = vector.multi_reduction <maximumf>, %62, %cst_27 [1] : vector<8x128xf32> to vector<8xf32>
    %64 = vector.shape_cast %63 : vector<8xf32> to vector<8x1xf32>
    %65 = vector.broadcast %64 : vector<8x1xf32> to vector<8x128xf32>
    %66 = arith.subf %62, %65 : vector<8x128xf32>
    %67 = math.exp %66 : vector<8x128xf32>
    %cst_28 = arith.constant dense<0.000000e+00> : vector<8xf32>
    %68 = vector.multi_reduction <add>, %67, %cst_28 [1] : vector<8x128xf32> to vector<8xf32>
    %69 = vector.shape_cast %68 : vector<8xf32> to vector<8x1xf32>
    %70 = math.log %69 : vector<8x1xf32>
    %71 = vector.broadcast %70 : vector<8x1xf32> to vector<8x128xf32>
    %72 = arith.subf %66, %71 : vector<8x128xf32>
    %cst_29 = arith.constant 5.000000e-01 : f32
    %73 = vector.broadcast %cst_29 : f32 to vector<8x128xf32>
    %74 = arith.mulf %59, %73 : vector<8x128xf32>
    %cst_30 = arith.constant dense<0xFF800000> : vector<8xf32>
    %75 = vector.multi_reduction <maximumf>, %74, %cst_30 [1] : vector<8x128xf32> to vector<8xf32>
    %76 = vector.shape_cast %75 : vector<8xf32> to vector<8x1xf32>
    %77 = vector.broadcast %76 : vector<8x1xf32> to vector<8x128xf32>
    %78 = arith.subf %74, %77 : vector<8x128xf32>
    %79 = math.exp %78 : vector<8x128xf32>
    %cst_31 = arith.constant dense<0.000000e+00> : vector<8xf32>
    %80 = vector.multi_reduction <add>, %79, %cst_31 [1] : vector<8x128xf32> to vector<8xf32>
    %81 = vector.shape_cast %80 : vector<8xf32> to vector<8x1xf32>
    %82 = math.log %81 : vector<8x1xf32>
    %83 = vector.broadcast %82 : vector<8x1xf32> to vector<8x128xf32>
    %84 = arith.subf %78, %83 : vector<8x128xf32>
    %85 = tpu.reciprocal %81 {approx = true} : vector<8x1xf32> -> vector<8x1xf32>
    %86 = vector.broadcast %85 : vector<8x1xf32> to vector<8x128xf32>
    %87 = arith.mulf %79, %86 : vector<8x128xf32>
    %88 = arith.subf %84, %72 : vector<8x128xf32>
    %89 = arith.mulf %87, %88 : vector<8x128xf32>
    %90 = vector.shape_cast %89 : vector<8x128xf32> to vector<1x8x128xf32>
    %cst_32 = arith.constant dense<0.000000e+00> : vector<1xf32>
    %91 = vector.multi_reduction <add>, %90, %cst_32 [1, 2] : vector<1x8x128xf32> to vector<1xf32>
    %92 = vector.shape_cast %91 : vector<1xf32> to vector<1x1x1xf32>
    %93 = vector.extract %92[0, 0, 0] : f32 from vector<1x1x1xf32>
    %cst_33 = arith.constant 3.906250e-03 : f32
    %94 = arith.mulf %93, %cst_33 : f32
    %cst_34 = arith.constant 5.000000e-01 : f32
    %95 = vector.broadcast %cst_34 : f32 to vector<8x128xf32>
    %96 = arith.mulf %1, %95 : vector<8x128xf32>
    %cst_35 = arith.constant dense<0xFF800000> : vector<8xf32>
    %97 = vector.multi_reduction <maximumf>, %96, %cst_35 [1] : vector<8x128xf32> to vector<8xf32>
    %98 = vector.shape_cast %97 : vector<8xf32> to vector<8x1xf32>
    %99 = vector.broadcast %98 : vector<8x1xf32> to vector<8x128xf32>
    %100 = arith.subf %96, %99 : vector<8x128xf32>
    %101 = math.exp %100 : vector<8x128xf32>
    %cst_36 = arith.constant dense<0.000000e+00> : vector<8xf32>
    %102 = vector.multi_reduction <add>, %101, %cst_36 [1] : vector<8x128xf32> to vector<8xf32>
    %103 = vector.shape_cast %102 : vector<8xf32> to vector<8x1xf32>
    %104 = math.log %103 : vector<8x1xf32>
    %105 = vector.broadcast %104 : vector<8x1xf32> to vector<8x128xf32>
    %106 = arith.subf %100, %105 : vector<8x128xf32>
    %cst_37 = arith.constant 5.000000e-01 : f32
    %107 = vector.broadcast %cst_37 : f32 to vector<8x128xf32>
    %108 = arith.mulf %60, %107 : vector<8x128xf32>
    %cst_38 = arith.constant dense<0xFF800000> : vector<8xf32>
    %109 = vector.multi_reduction <maximumf>, %108, %cst_38 [1] : vector<8x128xf32> to vector<8xf32>
    %110 = vector.shape_cast %109 : vector<8xf32> to vector<8x1xf32>
    %111 = vector.broadcast %110 : vector<8x1xf32> to vector<8x128xf32>
    %112 = arith.subf %108, %111 : vector<8x128xf32>
    %113 = math.exp %112 : vector<8x128xf32>
    %cst_39 = arith.constant dense<0.000000e+00> : vector<8xf32>
    %114 = vector.multi_reduction <add>, %113, %cst_39 [1] : vector<8x128xf32> to vector<8xf32>
    %115 = vector.shape_cast %114 : vector<8xf32> to vector<8x1xf32>
    %116 = math.log %115 : vector<8x1xf32>
    %117 = vector.broadcast %116 : vector<8x1xf32> to vector<8x128xf32>
    %118 = arith.subf %112, %117 : vector<8x128xf32>
    %119 = tpu.reciprocal %115 {approx = true} : vector<8x1xf32> -> vector<8x1xf32>
    %120 = vector.broadcast %119 : vector<8x1xf32> to vector<8x128xf32>
    %121 = arith.mulf %113, %120 : vector<8x128xf32>
    %122 = arith.subf %118, %106 : vector<8x128xf32>
    %123 = arith.mulf %121, %122 : vector<8x128xf32>
    %124 = vector.shape_cast %123 : vector<8x128xf32> to vector<1x8x128xf32>
    %cst_40 = arith.constant dense<0.000000e+00> : vector<1xf32>
    %125 = vector.multi_reduction <add>, %124, %cst_40 [1, 2] : vector<1x8x128xf32> to vector<1xf32>
    %126 = vector.shape_cast %125 : vector<1xf32> to vector<1x1x1xf32>
    %127 = vector.extract %126[0, 0, 0] : f32 from vector<1x1x1xf32>
    %cst_41 = arith.constant 3.906250e-03 : f32
    %128 = arith.mulf %127, %cst_41 : f32
    %129 = arith.addf %94, %128 : f32
    %cst_42 = arith.constant 5.000000e-01 : f32
    %130 = arith.mulf %cst_42, %129 : f32
    %cst_43 = arith.constant 6.000000e-01 : f32
    %131 = arith.mulf %cst_43, %50 : f32
    %cst_44 = arith.constant 4.000000e-01 : f32
    %132 = arith.mulf %cst_44, %130 : f32
    %133 = arith.addf %131, %132 : f32
    %c0_45 = arith.constant 0 : index
    %134 = memref.load %arg6[%c0_45] : memref<2xf32, #tpu.memory_space<smem>>
    memref.store %133, %arg6[%c0_45] : memref<2xf32, #tpu.memory_space<smem>>
    %c1 = arith.constant 1 : index
    %135 = memref.load %arg6[%c1] : memref<2xf32, #tpu.memory_space<smem>>
    memref.store %130, %arg6[%c1] : memref<2xf32, #tpu.memory_space<smem>>
    return
  }
}

</mosaic_0001>

<bundles_post_ra>
// kernel: tpu_custom_call.1
= control target key start
LH: loop header
LB: loop body
LE: loop exit
PB: predicated region body
PF: predicated region fallthrough
CT: control target
= control target key end

     0   :  { %11 = vsyncpa [#allocation3], 0  ;;  %s1548_s0 = inlined_call_operand.hbm [shape: f32[8,128], index: 0, kind: input, shape index: {}]   ;;  %s1549_s1 = inlined_call_operand.hbm [shape: f32[8,128], index: 1, kind: input, shape index: {}]   ;;  %s1550_s2 = inlined_call_operand.hbm [shape: f32[8,128], index: 2, kind: input, shape index: {}]   ;;  %s1551_s3 = inlined_call_operand.hbm [shape: f32[8,768], index: 3, kind: input, shape index: {}]   ;;  %s1552_s4 = inlined_call_operand.hbm [shape: bf16[768,256], index: 4, kind: input, shape index: {}]   ;;  %s1553_s5 = inlined_call_operand.vmem [shape: bf16[1,256], index: 5, kind: input, shape index: {}]   ;;  %s1554_s6 = inlined_call_operand.hbm [shape: f32[2], index: 6, kind: output, shape index: {}]  }
   0x1   :  { %12 = vsyncpa [#allocation6], 0 }
   0x2   :  { %13 = vsyncpa [#allocation9], 0 }
   0x3   :  { %14 = vsyncpa [#allocation4], 0  ;;  %s1396_s21 = smov [#allocation5]   ;;  %s1397_s23 = smov [#allocation8]  }
   0x4   :  { %s31_s22 = sshll.u32 %s1396_s21, 4  ;;  %s51_s24 = sshll.u32 %s1397_s23, 4  ;;  %s32_s22 = int_to_ptr.vmem [resolvable:$true] %s31_s22  ;;  %s52_s24 = int_to_ptr.vmem [resolvable:$true] %s51_s24 }
   0x5   :  { %s1268_s27 = scalar_lea.hbm %s1549_s1, 128 }
   0x6   :  { %p1269_p0 = scmp.ne.s32.totalorder %s1549_s1, %s1268_s27  ;;  %p1272_p1 = scmp.lt.u32.totalorder %s1268_s27, %s1549_s1 }
   0x8   :  { %p1274_p2 = pnand %p1272_p1, %p1269_p0 }
   0xa   :  { %1277 = shalt.err (!%p1274_p2)
}
   0xb   :  { %s1278_s8 = scalar_lea.vmem %s32_s22, 128  ;;  %p1283_p4 = scmp.lt.s32.totalorder %s32_s22, %s32_s22 }
   0xc   :  { %p1279_p3 = scmp.ne.s32.totalorder %s32_s22, %s1278_s8  ;;  %p1284_p5 = scmp.lt.s32.totalorder %s1278_s8, %s1278_s8 }
   0xe   :  { %p1285_p6 = por %p1284_p5, %p1283_p4 }
  0x10   :  { %p1286_p7 = pnand %p1285_p6, %p1279_p3 }
  0x12   :  { %1289 = shalt.err (!%p1286_p7)
}
  0x13   :  { %34 = dma.hbm_to_vmem [thread:$0]  %s1549_s1, 128, %s32_s22, [#allocation6]  }
  0x14   :  { %s1290_s13 = scalar_lea.hbm %s1551_s3, 768 }
  0x15   :  { %p1291_p8 = scmp.ne.s32.totalorder %s1551_s3, %s1290_s13  ;;  %p1294_p9 = scmp.lt.u32.totalorder %s1290_s13, %s1551_s3 }
  0x17   :  { %p1296_p10 = pnand %p1294_p9, %p1291_p8 }
  0x19   :  { %1299 = shalt.err (!%p1296_p10)
}
  0x1a   :  { %s1300_s18 = scalar_lea.vmem %s52_s24, 768  ;;  %p1305_p12 = scmp.lt.s32.totalorder %s52_s24, %s52_s24 }
  0x1b   :  { %p1301_p11 = scmp.ne.s32.totalorder %s52_s24, %s1300_s18  ;;  %p1306_p13 = scmp.lt.s32.totalorder %s1300_s18, %s1300_s18 }
  0x1d   :  { %p1307_p0 = por %p1306_p13, %p1305_p12 }
  0x1f   :  { %p1308_p1 = pnand %p1307_p0, %p1301_p11 }
  0x21   :  { %1311 = shalt.err (!%p1308_p1)
}
  0x22   :  { %54 = dma.hbm_to_vmem [thread:$0]  %s1551_s3, 768, %s52_s24, [#allocation9]  }
  0x23   :  { %s1398_s20 = smov [#allocation2]   ;;  %s1399_s22 = smov [#allocation7]  }
  0x24   :  { %s21_s21 = sshll.u32 %s1398_s20, 4  ;;  %s41_s23 = sshll.u32 %s1399_s22, 4  ;;  %s22_s21 = int_to_ptr.vmem [resolvable:$true] %s21_s21  ;;  %s42_s23 = int_to_ptr.vmem [resolvable:$true] %s41_s23 }
  0x25   :  { %s1312_s27 = scalar_lea.hbm %s1548_s0, 128 }
  0x26   :  { %p1313_p2 = scmp.ne.s32.totalorder %s1548_s0, %s1312_s27  ;;  %p1316_p3 = scmp.lt.u32.totalorder %s1312_s27, %s1548_s0 }
  0x28   :  { %p1318_p4 = pnand %p1316_p3, %p1313_p2 }
  0x2a   :  { %1321 = shalt.err (!%p1318_p4)
}
  0x2b   :  { %s1322_s3 = scalar_lea.vmem %s22_s21, 128  ;;  %p1327_p6 = scmp.lt.s32.totalorder %s22_s21, %s22_s21 }
  0x2c   :  { %p1323_p5 = scmp.ne.s32.totalorder %s22_s21, %s1322_s3  ;;  %p1328_p7 = scmp.lt.s32.totalorder %s1322_s3, %s1322_s3 }
  0x2e   :  { %p1329_p8 = por %p1328_p7, %p1327_p6 }
  0x30   :  { %p1330_p9 = pnand %p1329_p8, %p1323_p5 }
  0x32   :  { %1333 = shalt.err (!%p1330_p9)
}
  0x33   :  { %24 = dma.hbm_to_vmem [thread:$0]  %s1548_s0, 128, %s22_s21, [#allocation3]  }
  0x34   :  { %s1334_s11 = scalar_lea.hbm %s1550_s2, 128 }
  0x35   :  { %p1335_p10 = scmp.ne.s32.totalorder %s1550_s2, %s1334_s11  ;;  %p1338_p11 = scmp.lt.u32.totalorder %s1334_s11, %s1550_s2 }
  0x37   :  { %p1340_p12 = pnand %p1338_p11, %p1335_p10 }
  0x39   :  { %1343 = shalt.err (!%p1340_p12)
}
  0x3a   :  { %s1344_s16 = scalar_lea.vmem %s42_s23, 128  ;;  %p1349_p0 = scmp.lt.s32.totalorder %s42_s23, %s42_s23 }
  0x3b   :  { %p1345_p13 = scmp.ne.s32.totalorder %s42_s23, %s1344_s16  ;;  %p1350_p1 = scmp.lt.s32.totalorder %s1344_s16, %s1344_s16 }
  0x3d   :  { %p1351_p2 = por %p1350_p1, %p1349_p0 }
  0x3f   :  { %p1352_p3 = pnand %p1351_p2, %p1345_p13 }
  0x41   :  { %1355 = shalt.err (!%p1352_p3)
}
  0x42   :  { %44 = dma.hbm_to_vmem [thread:$0]  %s1550_s2, 128, %s42_s23, [#allocation6]  }
  0x43   :  { %s1400_s18 = smov [#allocation10]   ;;  %s1356_s21 = scalar_lea.hbm %s1552_s4, 12288 }
  0x44   :  { %s60_s1 = sshll.u32 %s1400_s18, 4  ;;  %p1357_p4 = scmp.ne.s32.totalorder %s1552_s4, %s1356_s21  ;;  %s61_s1 = int_to_ptr.vmem [resolvable:$true] %s60_s1 }
  0x45   :  { %p1360_p5 = scmp.lt.u32.totalorder %s1356_s21, %s1552_s4 }
  0x47   :  { %p1362_p6 = pnand %p1360_p5, %p1357_p4 }
  0x49   :  { %1365 = shalt.err (!%p1362_p6)
}
  0x4a   :  { %s1366_s28 = scalar_lea.vmem %s61_s1, 12288  ;;  %p1371_p8 = scmp.lt.s32.totalorder %s61_s1, %s61_s1 }
  0x4b   :  { %p1367_p7 = scmp.ne.s32.totalorder %s61_s1, %s1366_s28  ;;  %p1372_p9 = scmp.lt.s32.totalorder %s1366_s28, %s1366_s28 }
  0x4d   :  { %p1373_p10 = por %p1372_p9, %p1371_p8 }
  0x4f   :  { %p1374_p11 = pnand %p1373_p10, %p1367_p7 }
  0x51   :  { %1377 = shalt.err (!%p1374_p11)
}
  0x52   :  { %s1401_s2 = smov 128   ;;  %s1402_s23 = smov 8  }
  0x53   :  { %66 = dma.hbm_to_vmem [thread:$0]  %s1552_s4, 12288, %s61_s1, [#allocation9], %s1401_s2, %s1401_s2, %s1402_s23  }
  0x54   :  { %1388 = dma.done.wait [#allocation3], 128  }
  0x55   :  { %1389 = vsyncadd [#allocation3], 4294967168 }
  0x56   :  { %1390 = dma.done.wait [#allocation6], 256  }
  0x57   :  { %1391 = vsyncadd [#allocation6], 4294967040 }
  0x58   :  { %1392 = dma.done.wait [#allocation9], 13056  }
  0x59   :  { %1393 = vsyncadd [#allocation9], 4294954240  ;;  %v1094_v0 = vld [vmem:[#allocation10 + $0x104] ss:$8 sps:$4 sm:$0xff]   ;;  %v1096_v1 = vld [vmem:[#allocation10 + $0x100] ss:$8 sps:$4 sm:$0xff]  }
  0x5a   :  { %795 = vmatprep.subr.bf16.mxu0 %v1094_v0  ;;  %v1097_v2 = vld [vmem:[#allocation10 + $0x114] ss:$8 sps:$4 sm:$0xff]   ;;  %v1099_v3 = vld [vmem:[#allocation10 + $0x110] ss:$8 sps:$4 sm:$0xff]   ;;  %v1100_v4 = vld [vmem:[#allocation10 + $0x124] ss:$8 sps:$4 sm:$0xff]  }
  0x5b   :  { %796 = vmatpush1.bf16.msra.mxu0 %v1096_v1  ;;  %v1102_v5 = vld [vmem:[#allocation10 + $0x120] ss:$8 sps:$4 sm:$0xff]   ;;  %v1103_v6 = vld [vmem:[#allocation10 + $0x134] ss:$8 sps:$4 sm:$0xff]   ;;  %v1105_v8 = vld [vmem:[#allocation10 + $0x130] ss:$8 sps:$4 sm:$0xff]  }
  0x5c   :  { %797 = vmatprep.subr.bf16.mxu0 %v1097_v2  ;;  %v1499_v7 = vld [vmem:[#allocation2] sm:$0xff]  ;;  %v1106_v9 = vld [vmem:[#allocation10 + $0x144] ss:$8 sps:$4 sm:$0xff]   ;;  %v1108_v10 = vld [vmem:[#allocation10 + $0x140] ss:$8 sps:$4 sm:$0xff]   ;;  %vm115_vm0 = vcmask 7168  }
  0x5d   :  { %90 = vmax.xlane.f32.xlu0 %v1499_v7  ;;  %v1109_v11 = vld [vmem:[#allocation10 + $0x154] ss:$8 sps:$4 sm:$0xff]   ;;  %v1111_v12 = vld [vmem:[#allocation10 + $0x150] ss:$8 sps:$4 sm:$0xff]   ;;  %v1112_v13 = vld [vmem:[#allocation10 + $0x164] ss:$8 sps:$4 sm:$0xff]  }
  0x5e   :  { %v1139_v14 = vld [vmem:[#allocation10 + $0x4] ss:$8 sps:$4 sm:$0xff]   ;;  %v1141_v15 = vld [vmem:[#allocation10] ss:$8 sps:$4 sm:$0xff]   ;;  %v1115_v17 = vld [vmem:[#allocation10 + $0x174] ss:$8 sps:$4 sm:$0xff]  }
  0x5f   :  { %798 = vmatpush1.bf16.msra.mxu0 %v1099_v3  ;;  %v1114_v16 = vld [vmem:[#allocation10 + $0x160] ss:$8 sps:$4 sm:$0xff]   ;;  %754 = vmatprep.subr.bf16.mxu1 %v1139_v14  ;;  %v1145_v18 = vld [vmem:[#allocation10 + $0x14] ss:$8 sps:$4 sm:$0xff]   ;;  %v1147_v19 = vld [vmem:[#allocation10 + $0x10] ss:$8 sps:$4 sm:$0xff]  }
  0x60   :  { %799 = vmatprep.subr.bf16.mxu0 %v1100_v4  ;;  %755 = vmatpush1.bf16.msra.mxu1 %v1141_v15  ;;  %v148_v20 = vld [vmem:[#allocation8 + $0x18] sm:$0xff]  ;;  %v1117_v22 = vld [vmem:[#allocation10 + $0x170] ss:$8 sps:$4 sm:$0xff]   ;;  %v1503_v26 = vmul.f32 0.5, %v1499_v7  ;;  %v1157_v27 = vld [vmem:[#allocation10 + $0x34] ss:$8 sps:$4 sm:$0xff]  }
  0x61   :  { %756 = vmatprep.subr.bf16.mxu1 %v1145_v18  ;;  %v154_v21 = vpack.c.bf16 %v148_v20, %v148_v20  ;;  %v1151_v23 = vld [vmem:[#allocation10 + $0x24] ss:$8 sps:$4 sm:$0xff]   ;;  %v1153_v25 = vld [vmem:[#allocation10 + $0x20] ss:$8 sps:$4 sm:$0xff]   ;;  %v1121_v29 = vld [vmem:[#allocation10 + $0x194] ss:$8 sps:$4 sm:$0xff]  }
  0x62   :  { %v1118_v24 = vld [vmem:[#allocation10 + $0x184] ss:$8 sps:$4 sm:$0xff]   ;;  %878 = vmax.xlane.f32.xlu1 %v1503_v26  ;;  %v1120_v28 = vld [vmem:[#allocation10 + $0x180] ss:$8 sps:$4 sm:$0xff]   ;;  %v1159_v30 = vld [vmem:[#allocation10 + $0x30] ss:$8 sps:$4 sm:$0xff]  }
  0x63   :  { %800 = vmatpush1.bf16.msra.mxu0 %v1102_v5  ;;  %827 = vmatprep.mubr.bf16.mxu0 %v154_v21  ;;  %v1163_v31 = vld [vmem:[#allocation10 + $0x44] ss:$8 sps:$4 sm:$0xff]   ;;  %v1123_v32 = vld [vmem:[#allocation10 + $0x190] ss:$8 sps:$4 sm:$0xff]   ;;  %v1165_v34 = vld [vmem:[#allocation10 + $0x40] ss:$8 sps:$4 sm:$0xff]  }
  0x64   :  { %801 = vmatprep.subr.bf16.mxu0 %v1103_v6  ;;  %757 = vmatpush1.bf16.msra.mxu1 %v1147_v19  ;;  %v1124_v33 = vld [vmem:[#allocation10 + $0x1a4] ss:$8 sps:$4 sm:$0xff]   ;;  %v1169_v35 = vld [vmem:[#allocation10 + $0x54] ss:$8 sps:$4 sm:$0xff]   ;;  %v1126_v36 = vld [vmem:[#allocation10 + $0x1a0] ss:$8 sps:$4 sm:$0xff]  }
  0x65   :  { %758 = vmatprep.subr.bf16.mxu1 %v1151_v23  ;;  %v1127_v37 = vld [vmem:[#allocation10 + $0x1b4] ss:$8 sps:$4 sm:$0xff]   ;;  %v1171_v38 = vld [vmem:[#allocation10 + $0x50] ss:$8 sps:$4 sm:$0xff]   ;;  %v1175_v39 = vld [vmem:[#allocation10 + $0x64] ss:$8 sps:$4 sm:$0xff]  }
  0x66   :  { %v1129_v40 = vld [vmem:[#allocation10 + $0x1b0] ss:$8 sps:$4 sm:$0xff]   ;;  %v1130_v41 = vld [vmem:[#allocation10 + $0x1c4] ss:$8 sps:$4 sm:$0xff]   ;;  %v1177_v42 = vld [vmem:[#allocation10 + $0x60] ss:$8 sps:$4 sm:$0xff]  }
  0x67   :  { %802 = vmatpush1.bf16.msra.mxu0 %v1105_v8  ;;  %v1181_v43 = vld [vmem:[#allocation10 + $0x74] ss:$8 sps:$4 sm:$0xff]   ;;  %v1132_v44 = vld [vmem:[#allocation10 + $0x1c0] ss:$8 sps:$4 sm:$0xff]   ;;  %v1183_v46 = vld [vmem:[#allocation10 + $0x70] ss:$8 sps:$4 sm:$0xff]  }
  0x68   :  { %803 = vmatprep.subr.bf16.mxu0 %v1106_v9  ;;  %759 = vmatpush1.bf16.msra.mxu1 %v1153_v25  ;;  %v1133_v45 = vld [vmem:[#allocation10 + $0x1d4] ss:$8 sps:$4 sm:$0xff]   ;;  %v1187_v47 = vld [vmem:[#allocation10 + $0x84] ss:$8 sps:$4 sm:$0xff]   ;;  %v1135_v48 = vld [vmem:[#allocation10 + $0x1d0] ss:$8 sps:$4 sm:$0xff]  }
  0x69   :  { %760 = vmatprep.subr.bf16.mxu1 %v1157_v27  ;;  %v1136_v49 = vld [vmem:[#allocation10 + $0x1e4] ss:$8 sps:$4 sm:$0xff]   ;;  %v1189_v50 = vld [vmem:[#allocation10 + $0x80] ss:$8 sps:$4 sm:$0xff]   ;;  %v1193_v51 = vld [vmem:[#allocation10 + $0x94] ss:$8 sps:$4 sm:$0xff]  }
  0x6a   :  { %v1138_v52 = vld [vmem:[#allocation10 + $0x1e0] ss:$8 sps:$4 sm:$0xff]   ;;  %v1142_v53 = vld [vmem:[#allocation10 + $0x1f4] ss:$8 sps:$4 sm:$0xff]   ;;  %v1195_v54 = vld [vmem:[#allocation10 + $0x90] ss:$8 sps:$4 sm:$0xff]  }
  0x6b   :  { %804 = vmatpush1.bf16.msra.mxu0 %v1108_v10  ;;  %v1199_v55 = vld [vmem:[#allocation10 + $0xa4] ss:$8 sps:$4 sm:$0xff]   ;;  %v1144_v56 = vld [vmem:[#allocation10 + $0x1f0] ss:$8 sps:$4 sm:$0xff]   ;;  %v1201_v59 = vld [vmem:[#allocation10 + $0xa0] ss:$8 sps:$4 sm:$0xff]  }
  0x6c   :  { %805 = vmatprep.subr.bf16.mxu0 %v1109_v11  ;;  %761 = vmatpush1.bf16.msra.mxu1 %v1159_v30  ;;  %v147_v57 = vld [vmem:[#allocation8 + $0x10] sm:$0xff]  ;;  %v1205_v60 = vld [vmem:[#allocation10 + $0xb4] ss:$8 sps:$4 sm:$0xff]   ;;  %v1207_v1 = vld [vmem:[#allocation10 + $0xb0] ss:$8 sps:$4 sm:$0xff]   ;;  %s1378_s20 = scalar_lea.hbm %s1554_s6, 16 }
  0x6d   :  { %762 = vmatprep.subr.bf16.mxu1 %v1163_v31  ;;  %v1150_v58 = vld [vmem:[#allocation10 + $0x204] ss:$8 sps:$4 sm:$0xff]   ;;  %v153_v61 = vpack.c.bf16 %v147_v57, %v147_v57  ;;  %v1148_v62 = vld [vmem:[#allocation10 + $0x200] ss:$8 sps:$4 sm:$0xff]   ;;  %v1156_v63 = vld [vmem:[#allocation10 + $0x214] ss:$8 sps:$4 sm:$0xff]   ;;  %p1379_p12 = scmp.ne.s32.totalorder %s1554_s6, %s1378_s20  ;;  %p1382_p13 = scmp.lt.u32.totalorder %s1378_s20, %s1554_s6 }
  0x6e   :  { %v146_v0 = vld [vmem:[#allocation8 + $0x8] sm:$0xff]  ;;  %v1211_v3 = vld [vmem:[#allocation10 + $0xc4] ss:$8 sps:$4 sm:$0xff]   ;;  %v1213_v11 = vld [vmem:[#allocation10 + $0xc0] ss:$8 sps:$4 sm:$0xff]  }
  0x6f   :  { %806 = vmatpush1.bf16.msra.mxu0 %v1111_v12  ;;  %v152_v2 = vpack.c.bf16 %v146_v0, %v146_v0  ;;  %v150_v4 = vld [vmem:[#allocation8 + $0x28] sm:$0xff]  ;;  %v1506_v6 = vld [vmem:[#allocation5] sm:$0xff]  ;;  %p1384_p0 = pnand %p1382_p13, %p1379_p12 }
  0x70   :  { %807 = vmatprep.subr.bf16.mxu0 %v1112_v13  ;;  %763 = vmatpush1.bf16.msra.mxu1 %v1165_v34  ;;  %v156_v5 = vpack.c.bf16 %v150_v4, %v150_v4  ;;  %v1154_v8 = vld [vmem:[#allocation10 + $0x210] ss:$8 sps:$4 sm:$0xff]   ;;  %v1510_v9 = vmul.f32 0.5, %v1506_v6  ;;  %v1162_v10 = vld [vmem:[#allocation10 + $0x224] ss:$8 sps:$4 sm:$0xff]  }
  0x71   :  { %764 = vmatprep.subr.bf16.mxu1 %v1169_v35  ;;  %786 = vmatprep.mubr.bf16.mxu1 %v152_v2  ;;  %v1217_v12 = vld [vmem:[#allocation10 + $0xd4] ss:$8 sps:$4 sm:$0xff]   ;;  %v1160_v13 = vld [vmem:[#allocation10 + $0x220] ss:$8 sps:$4 sm:$0xff]   ;;  %v1219_v15 = vld [vmem:[#allocation10 + $0xd0] ss:$8 sps:$4 sm:$0xff]   ;;  %v256_v2 = vlaneseq }
  0x72   :  { %100 = vmax.xlane.f32.xlu0 %v1506_v6  ;;  %v1168_v14 = vld [vmem:[#allocation10 + $0x234] ss:$8 sps:$4 sm:$0xff]   ;;  %v1174_v18 = vld [vmem:[#allocation10 + $0x244] ss:$8 sps:$4 sm:$0xff]   ;;  %v1225_v19 = vld [vmem:[#allocation10 + $0xe0] ss:$8 sps:$4 sm:$0xff]  }
  0x73   :  { %808 = vmatpush1.bf16.msra.mxu0 %v1114_v16  ;;  %v1223_v16 = vld [vmem:[#allocation10 + $0xe4] ss:$8 sps:$4 sm:$0xff]   ;;  %v1229_v20 = vld [vmem:[#allocation10 + $0xf4] ss:$8 sps:$4 sm:$0xff]   ;;  %v1172_v21 = vld [vmem:[#allocation10 + $0x240] ss:$8 sps:$4 sm:$0xff]  }
  0x74   :  { %809 = vmatprep.subr.bf16.mxu0 %v1115_v17  ;;  %765 = vmatpush1.bf16.msra.mxu1 %v1171_v38  ;;  %v1166_v17 = vld [vmem:[#allocation10 + $0x230] ss:$8 sps:$4 sm:$0xff]   ;;  %v1192_v30 = vld [vmem:[#allocation10 + $0x274] ss:$8 sps:$4 sm:$0xff]  }
  0x75   :  { %766 = vmatprep.subr.bf16.mxu1 %v1175_v39  ;;  %v1231_v23 = vld [vmem:[#allocation10 + $0xf0] ss:$8 sps:$4 sm:$0xff]   ;;  %v1204_v34 = vld [vmem:[#allocation10 + $0x294] ss:$8 sps:$4 sm:$0xff]  }
  0x76   :  { %914 = vmax.xlane.f32.xlu0 %v1510_v9  ;;  %v1178_v25 = vld [vmem:[#allocation10 + $0x250] ss:$8 sps:$4 sm:$0xff]   ;;  %v1216_v38 = vld [vmem:[#allocation10 + $0x2b4] ss:$8 sps:$4 sm:$0xff]  }
  0x77   :  { %810 = vmatpush1.bf16.msra.mxu0 %v1117_v22  ;;  %v1180_v22 = vld [vmem:[#allocation10 + $0x254] ss:$8 sps:$4 sm:$0xff]   ;;  %v1190_v31 = vld [vmem:[#allocation10 + $0x270] ss:$8 sps:$4 sm:$0xff]  }
  0x78   :  { %811 = vmatprep.subr.bf16.mxu0 %v1118_v24  ;;  %767 = vmatpush1.bf16.msra.mxu1 %v1177_v42  ;;  %v145_v24 = vld [vmem:[#allocation8] sm:$0xff]  ;;  %v253_v4 = vld [vmem:[%s1553_s5] sm:$0x3] }
  0x79   :  { %768 = vmatprep.subr.bf16.mxu1 %v1181_v43  ;;  %v151_v27 = vpack.c.bf16 %v145_v24, %v145_v24  ;;  %v1202_v35 = vld [vmem:[#allocation10 + $0x290] ss:$8 sps:$4 sm:$0xff]   ;;  %v1228_v42 = vld [vmem:[#allocation10 + $0x2d4] ss:$8 sps:$4 sm:$0xff]  }
  0x7a   :  { %v1214_v39 = vld [vmem:[#allocation10 + $0x2b0] ss:$8 sps:$4 sm:$0xff]  }
  0x7b   :  { %812 = vmatpush1.bf16.msra.mxu0 %v1120_v28  ;;  %v1186_v28 = vld [vmem:[#allocation10 + $0x264] ss:$8 sps:$4 sm:$0xff]   ;;  %v1226_v43 = vld [vmem:[#allocation10 + $0x2d0] ss:$8 sps:$4 sm:$0xff]  }
  0x7c   :  { %813 = vmatprep.subr.bf16.mxu0 %v1121_v29  ;;  %769 = vmatpush1.bf16.msra.mxu1 %v1183_v46  ;;  %v1184_v29 = vld [vmem:[#allocation10 + $0x260] ss:$8 sps:$4 sm:$0xff]   ;;  %v1237_v46 = vld [vmem:[#allocation10 + $0x2f4] ss:$8 sps:$4 sm:$0xff]  }
  0x7d   :  { %770 = vmatprep.subr.bf16.mxu1 %v1187_v47  ;;  %v1235_v47 = vld [vmem:[#allocation10 + $0x2f0] ss:$8 sps:$4 sm:$0xff]  }
  0x7f   :  { %814 = vmatpush1.bf16.msra.mxu0 %v1123_v32  ;;  %v1198_v32 = vld [vmem:[#allocation10 + $0x284] ss:$8 sps:$4 sm:$0xff]  }
  0x80   :  { %815 = vmatprep.subr.bf16.mxu0 %v1124_v33  ;;  %771 = vmatpush1.bf16.msra.mxu1 %v1189_v50  ;;  %v1196_v33 = vld [vmem:[#allocation10 + $0x280] ss:$8 sps:$4 sm:$0xff]  }
  0x81   :  { %772 = vmatprep.subr.bf16.mxu1 %v1193_v51 }
  0x83   :  { %816 = vmatpush1.bf16.msra.mxu0 %v1126_v36  ;;  %v1210_v36 = vld [vmem:[#allocation10 + $0x2a4] ss:$8 sps:$4 sm:$0xff]  }
  0x84   :  { %817 = vmatprep.subr.bf16.mxu0 %v1127_v37  ;;  %773 = vmatpush1.bf16.msra.mxu1 %v1195_v54  ;;  %v1208_v37 = vld [vmem:[#allocation10 + $0x2a0] ss:$8 sps:$4 sm:$0xff]  }
  0x85   :  { %774 = vmatprep.subr.bf16.mxu1 %v1199_v55 }
  0x87   :  { %818 = vmatpush1.bf16.msra.mxu0 %v1129_v40  ;;  %v1222_v40 = vld [vmem:[#allocation10 + $0x2c4] ss:$8 sps:$4 sm:$0xff]  }
  0x88   :  { %819 = vmatprep.subr.bf16.mxu0 %v1130_v41  ;;  %775 = vmatpush1.bf16.msra.mxu1 %v1201_v59  ;;  %v1220_v41 = vld [vmem:[#allocation10 + $0x2c0] ss:$8 sps:$4 sm:$0xff]  }
  0x89   :  { %776 = vmatprep.subr.bf16.mxu1 %v1205_v60 }
  0x8b   :  { %820 = vmatpush1.bf16.msra.mxu0 %v1132_v44  ;;  %v1234_v44 = vld [vmem:[#allocation10 + $0x2e4] ss:$8 sps:$4 sm:$0xff]  }
  0x8c   :  { %821 = vmatprep.subr.bf16.mxu0 %v1133_v45  ;;  %777 = vmatpush1.bf16.msra.mxu1 %v1207_v1  ;;  %v1232_v45 = vld [vmem:[#allocation10 + $0x2e0] ss:$8 sps:$4 sm:$0xff]  }
  0x8d   :  { %778 = vmatprep.subr.bf16.mxu1 %v1211_v3  ;;  %v257_v3 = vshrl.u32 %v256_v2, 7 }
  0x8f   :  { %822 = vmatpush1.bf16.msra.mxu0 %v1135_v48  ;;  %v149_v48 = vld [vmem:[#allocation8 + $0x20] sm:$0xff] }
  0x90   :  { %823 = vmatprep.subr.bf16.mxu0 %v1136_v49  ;;  %779 = vmatpush1.bf16.msra.mxu1 %v1213_v11  ;;  %v155_v49 = vpack.c.bf16 %v149_v48, %v149_v48 }
  0x91   :  { %780 = vmatprep.subr.bf16.mxu1 %v1217_v12 }
  0x93   :  { %824 = vmatpush1.bf16.msra.mxu0 %v1138_v52 }
  0x94   :  { %825 = vmatprep.subr.bf16.mxu0 %v1142_v53  ;;  %781 = vmatpush1.bf16.msra.mxu1 %v1219_v15 }
  0x95   :  { %782 = vmatprep.subr.bf16.mxu1 %v1223_v16 }
  0x97   :  { %826 = vmatpush1.bf16.msra.mxu0 %v1144_v56 }
  0x98   :  { %836 = vmatprep.subr.bf16.mxu0 %v1150_v58  ;;  %783 = vmatpush1.bf16.msra.mxu1 %v1225_v19 }
  0x99   :  { %784 = vmatprep.subr.bf16.mxu1 %v1229_v20 }
  0x9a   :  { %828 = vmatmul.mubr.bf16.vlgmr.msra.gmra.mrb[0].mxu0 %v153_v61 }
  0x9b   :  { %837 = vmatpush1.bf16.msra.mxu0 %v1148_v62  ;;  %868 = vmatprep.mubr.bf16.mxu0 %v156_v5  ;;  %v86_v62 = vld [vmem:[#allocation7] sm:$0xff]  ;;  %v254_v5 = vunpack.c.l.bf16 %v253_v4 }
  0x9c   :  { %838 = vmatprep.subr.bf16.mxu0 %v1156_v63  ;;  %785 = vmatpush1.bf16.msra.mxu1 %v1231_v23 }
  0x9f   :  { %839 = vmatpush1.bf16.msra.mxu0 %v1154_v8  ;;  %787 = vmatmul.mubr.bf16.vlgmr.msra.gmra.mrb[0].mxu1 %v151_v27  ;;  %v258_v8 = vsub.s32 0, %v257_v3 }
  0xa0   :  { %840 = vmatprep.subr.bf16.mxu0 %v1162_v10 }
  0xa1   :  { %v259_v10 = vrot.slane %v254_v5, %v258_v8 }
  0xa3   :  { %841 = vmatpush1.bf16.msra.mxu0 %v1160_v13  ;;  %v269_v13 = vrot.slane %v259_v10, %v258_v8 }
  0xa4   :  { %842 = vmatprep.subr.bf16.mxu0 %v1168_v14 }
  0xa7   :  { %843 = vmatpush1.bf16.msra.mxu0 %v1166_v17 }
  0xa8   :  { %844 = vmatprep.subr.bf16.mxu0 %v1174_v18 }
  0xab   :  { %845 = vmatpush1.bf16.msra.mxu0 %v1172_v21 }
  0xac   :  { %846 = vmatprep.subr.bf16.mxu0 %v1180_v22 }
  0xaf   :  { %847 = vmatpush1.bf16.msra.mxu0 %v1178_v25 }
  0xb0   :  { %848 = vmatprep.subr.bf16.mxu0 %v1186_v28 }
  0xb3   :  { %849 = vmatpush1.bf16.msra.mxu0 %v1184_v29 }
  0xb4   :  { %850 = vmatprep.subr.bf16.mxu0 %v1192_v30 }
  0xb7   :  { %851 = vmatpush1.bf16.msra.mxu0 %v1190_v31 }
  0xb8   :  { %852 = vmatprep.subr.bf16.mxu0 %v1198_v32 }
  0xbb   :  { %853 = vmatpush1.bf16.msra.mxu0 %v1196_v33 }
  0xbc   :  { %854 = vmatprep.subr.bf16.mxu0 %v1204_v34 }
  0xbf   :  { %855 = vmatpush1.bf16.msra.mxu0 %v1202_v35 }
  0xc0   :  { %856 = vmatprep.subr.bf16.mxu0 %v1210_v36 }
  0xc3   :  { %857 = vmatpush1.bf16.msra.mxu0 %v1208_v37 }
  0xc4   :  { %858 = vmatprep.subr.bf16.mxu0 %v1216_v38 }
  0xc7   :  { %859 = vmatpush1.bf16.msra.mxu0 %v1214_v39 }
  0xc8   :  { %860 = vmatprep.subr.bf16.mxu0 %v1222_v40 }
  0xcb   :  { %861 = vmatpush1.bf16.msra.mxu0 %v1220_v41 }
  0xcc   :  { %862 = vmatprep.subr.bf16.mxu0 %v1228_v42 }
  0xcf   :  { %863 = vmatpush1.bf16.msra.mxu0 %v1226_v43 }
  0xd0   :  { %864 = vmatprep.subr.bf16.mxu0 %v1234_v44 }
  0xd3   :  { %865 = vmatpush1.bf16.msra.mxu0 %v1232_v45 }
  0xd4   :  { %866 = vmatprep.subr.bf16.mxu0 %v1237_v46 }
  0xd7   :  { %867 = vmatpush1.bf16.msra.mxu0 %v1235_v47 }
  0xda   :  { %869 = vmatmul.mubr.bf16.vlgmr.msra.gmra.mrb[0].mxu0 %v155_v49 }
  0xea   :  { %v91_v50 = vpop.xlane.xlu0 %90 }
  0xeb   :  { %v1514_v51 = vsub.f32 %v1499_v7, %v91_v50 }
  0xed   :  { %v93_v52 = vmul.f32 1.442695, %v1514_v51 }
  0xef   :  { %1238 = vpow2.f32 %v93_v52  ;;  %v879_v54 = vpop.xlane.xlu1 %878 }
  0xf0   :  { %v1518_v55 = vsub.f32 %v1503_v26, %v879_v54 }
  0xf2   :  { %v881_v56 = vmul.f32 1.442695, %v1518_v55 }
  0xf4   :  { %1240 = vpow2.f32 %v881_v56 }
  0xf9   :  { %v1239_v53 = vpop.eup %1238 }
  0xfa   :  { %95 = vadd.xlane.f32.xlu0 %v1239_v53 }
  0xfe   :  { %v1241_v57 = vpop.eup %1240 }
  0xff   :  { %883 = vadd.xlane.f32.xlu0 %v1241_v57  ;;  %v101_v58 = vpop.xlane.xlu0 %100 }
 0x100   :  { %v102_v12 = vsub.f32 %v1506_v6, %v101_v58 }
 0x102   :  { %v103_v15 = vmul.f32 1.442695, %v102_v12 }
 0x103   :  { %v915_v59 = vpop.xlane.xlu0 %914 }
 0x104   :  { %v1522_v60 = vsub.f32 %v1510_v9, %v915_v59  ;;  %v262_v9 = vsub.s32 2, %v257_v3 }
 0x106   :  { %v917_v7 = vmul.f32 1.442695, %v1522_v60  ;;  %v263_v11 = vrot.slane %v254_v5, %v262_v9 }
 0x108   :  { %1242 = vpow2.f32 %v917_v7  ;;  %v273_v14 = vrot.slane %v263_v11, %v258_v8 }
 0x109   :  { %1244 = vpow2.f32 %v103_v15 }
 0x112   :  { %v1243_v61 = vpop.eup %1242 }
 0x113   :  { %919 = vadd.xlane.f32.xlu0 %v1243_v61  ;;  %v1245_v27 = vpop.eup %1244 }
 0x117   :  { %87 = vadd.xlane.f32.xlu0 %v86_v62 }
 0x172   :  { %v788_v63 = vpop.f32.mrb[0].mxu1 }
 0x173   :  { %v790_v26 = vpop.f32.mrb[1].mxu1  ;;  %v789_v16 = vadd.f32 %v788_v63, %v269_v13 }
 0x174   :  { %v792_v0 = vpop.f32.mrb[2].mxu1  ;;  %v791_v17 = vadd.f32 %v790_v26, %v273_v14 }
 0x175   :  { %v793_v1 = vpop.f32.mrb[3].mxu1 }
 0x187   :  { %v96_v28 = vpop.xlane.xlu0 %95 }
 0x188   :  { %1246 = vlog2.f32 %v96_v28 }
 0x18c   :  { %v884_v45 = vpop.xlane.xlu0 %883 }
 0x192   :  { %v1247_v35 = vpop.eup %1246 }
 0x193   :  { %v98_v36 = vmul.f32 0.6931472, %v1247_v35 }
 0x195   :  { %v99_v38 = vsub.f32 %v1514_v51, %v98_v36 }
 0x197   :  { %v110_v42 = vmul.f32 %v99_v38, %v86_v62 }
 0x1a0   :  { %v920_v46 = vpop.xlane.xlu0 %919 }
 0x1a4   :  { %v88_v47 = vpop.xlane.xlu0 %87 }
 0x1ad   :  { %v870_v18 = vpop.f32.mrb[0].mxu0 }
 0x1ae   :  { %v1071_v19 = vadd.f32 %v870_v18, %v789_v16  ;;  %v872_v20 = vpop.f32.mrb[1].mxu0 }
 0x1af   :  { %v1073_v21 = vadd.f32 %v872_v20, %v791_v17  ;;  %v874_v22 = vpop.f32.mrb[2].mxu0 }
 0x1b0   :  { %v888_v23 = vmul.f32 0.5, %v1071_v19  ;;  %v875_v24 = vpop.f32.mrb[3].mxu0 }
 0x1b1   :  { %v924_v25 = vmul.f32 0.5, %v1073_v21 }
 0x1b2   :  { %889 = vmax.xlane.f32.xlu1 %v888_v23 }
 0x1b6   :  { %925 = vmax.xlane.f32.xlu1 %v924_v25 }
 0x1ba   :  { %105 = vadd.xlane.f32.xlu1 %v1245_v27 }
 0x23f   :  { %v890_v6 = vpop.xlane.xlu1 %889 }
 0x240   :  { %v891_v29 = vsub.f32 %v888_v23, %v890_v6 }
 0x242   :  { %v892_v30 = vmul.f32 1.442695, %v891_v29 }
 0x243   :  { %v926_v31 = vpop.xlane.xlu1 %925 }
 0x244   :  { %1248 = vpow2.f32 %v892_v30  ;;  %v1529_v32 = vsub.f32 %v924_v25, %v926_v31 }
 0x246   :  { %v928_v33 = vmul.f32 1.442695, %v1529_v32 }
 0x247   :  { %v106_v34 = vpop.xlane.xlu1 %105 }
 0x248   :  { %1250 = vpow2.f32 %v928_v33 }
 0x249   :  { %1252 = vlog2.f32 %v106_v34 }
 0x24a   :  { %1254 = vlog2.f32 %v884_v45 }
 0x24b   :  { %1256 = vrcp.f32 %v88_v47 }
 0x24c   :  { %1258 = vlog2.f32 %v920_v46 }
 0x24e   :  { %v1249_v37 = vpop.eup %1248 }
 0x24f   :  { %894 = vadd.xlane.f32.xlu1 %v1249_v37 }
 0x252   :  { %v1251_v39 = vpop.eup %1250 }
 0x253   :  { %v1253_v40 = vpop.eup %1252  ;;  %930 = vadd.xlane.f32.xlu1 %v1251_v39 }
 0x254   :  { %v108_v41 = vmul.f32 0.6931472, %v1253_v40  ;;  %v1255_v50 = vpop.eup %1254 }
 0x255   :  { %v1257_v51 = vpop.eup %1256  ;;  %v886_v56 = vmul.f32 0.6931472, %v1255_v50 }
 0x256   :  { %v109_v43 = vsub.f32 %v102_v12, %v108_v41  ;;  %v1259_v54 = vpop.eup %1258 }
 0x257   :  { %111 = vadd.xlane.f32.xlu1 %v110_v42  ;;  %v887_v26 = vsub.f32 %v1518_v55, %v886_v56  ;;  %v922_v0 = vmul.f32 0.6931472, %v1259_v54 }
 0x258   :  { %v127_v44 = vmul.f32 %v109_v43, %v86_v62 }
 0x259   :  { %v923_v11 = vsub.f32 %v1522_v60, %v922_v0 }
 0x25a   :  { %128 = vadd.xlane.f32.xlu0 %v127_v44 }
 0x2dc   :  { %v895_v48 = vpop.xlane.xlu1 %894 }
 0x2dd   :  { %1260 = vlog2.f32 %v895_v48 }
 0x2de   :  { %1262 = vrcp.f32 %v895_v48 }
 0x2e0   :  { %v931_v49 = vpop.xlane.xlu1 %930 }
 0x2e1   :  { %1264 = vlog2.f32 %v931_v49 }
 0x2e2   :  { %1266 = vrcp.f32 %v931_v49 }
 0x2e4   :  { %v112_v52 = vpop.xlane.xlu1 %111 }
 0x2e5   :  { %v113_v53 = vsub.f32 0.0, %v112_v52 }
 0x2e7   :  { %v1261_v57 = vpop.eup %1260  ;;  %v129_v58 = vpop.xlane.xlu0 %128  ;;  %v114_v59 = vmul.f32 %v1257_v51, %v113_v53 }
 0x2e8   :  { %v897_v7 = vmul.f32 0.6931472, %v1261_v57  ;;  %v130_v61 = vsub.f32 0.0, %v129_v58  ;;  %v1263_v62 = vpop.eup %1262 }
 0x2e9   :  { %v116_v63 = vsel %vm115_vm0, %v114_v59, 0.0  ;;  %v900_v8 = vmul.f32 %v1263_v62, %v1249_v37 }
 0x2ea   :  { %117 = vadd.xlane.f32.xlu1 %v116_v63  ;;  %v131_v1 = vmul.f32 %v1257_v51, %v130_v61  ;;  %v898_v2 = vsub.f32 %v891_v29, %v897_v7 }
 0x2eb   :  { %v1265_v3 = vpop.eup %1264 }
 0x2ec   :  { %v933_v4 = vmul.f32 0.6931472, %v1265_v3  ;;  %v132_v5 = vsel %vm115_vm0, %v131_v1, 0.0  ;;  %v901_v9 = vsub.f32 %v898_v2, %v887_v26  ;;  %v1267_v10 = vpop.eup %1266 }
 0x2ed   :  { %133 = vadd.xlane.f32.xlu0 %v132_v5  ;;  %v936_v14 = vmul.f32 %v1267_v10, %v1251_v39 }
 0x2ee   :  { %v902_v12 = vmul.f32 %v901_v9, %v900_v8  ;;  %v934_v13 = vsub.f32 %v1529_v32, %v933_v4 }
 0x2f0   :  { %903 = vadd.xlane.f32.xlu1 %v902_v12  ;;  %v937_v15 = vsub.f32 %v934_v13, %v923_v11 }
 0x2f2   :  { %v938_v55 = vmul.f32 %v937_v15, %v936_v14 }
 0x2f4   :  { %939 = vadd.xlane.f32.xlu0 %v938_v55 }
 0x377   :  { %v118_v16 = vpop.xlane.xlu1 %117 }
 0x378   :  { %v119_v17 = vrot.slane %v118_v16, 4 }
 0x37a   :  { %v120_v18 = vadd.f32 %v119_v17, %v118_v16  ;;  %v134_v19 = vpop.xlane.xlu0 %133 }
 0x37b   :  { %v135_v20 = vrot.slane %v134_v19, 4 }
 0x37c   :  { %v121_v21 = vrot.slane %v120_v18, 2 }
 0x37d   :  { %v136_v22 = vadd.f32 %v135_v20, %v134_v19  ;;  %v904_v23 = vpop.xlane.xlu1 %903 }
 0x37e   :  { %v905_v24 = vrot.slane %v904_v23, 4  ;;  %v122_v25 = vadd.f32 %v121_v21, %v120_v18 }
 0x37f   :  { %v137_v27 = vrot.slane %v136_v22, 2 }
 0x380   :  { %v906_v60 = vadd.f32 %v905_v24, %v904_v23  ;;  %v123_v28 = vrot.slane %v122_v25, 1 }
 0x381   :  { %v940_v6 = vpop.xlane.xlu0 %939  ;;  %v138_v29 = vadd.f32 %v137_v27, %v136_v22 }
 0x382   :  { %v907_v30 = vrot.slane %v906_v60, 2  ;;  %v941_v31 = vrot.slane %v940_v6, 4  ;;  %v124_v32 = vadd.f32 %v123_v28, %v122_v25 }
 0x383   :  { %v139_v33 = vrot.slane %v138_v29, 1 }
 0x384   :  { %v908_v34 = vadd.f32 %v907_v30, %v906_v60  ;;  %v942_v35 = vadd.f32 %v941_v31, %v940_v6  ;;  %1078 = vpush %v124_v32 }
 0x385   :  { %v140_v36 = vadd.f32 %v139_v33, %v138_v29 }
 0x386   :  { %v943_v37 = vrot.slane %v942_v35, 2  ;;  %v909_v38 = vrot.slane %v908_v34, 1 }
 0x387   :  { %1080 = vpush %v140_v36 }
 0x388   :  { %v944_v39 = vadd.f32 %v943_v37, %v942_v35  ;;  %v910_v40 = vadd.f32 %v909_v38, %v908_v34 }
 0x38a   :  { %1082 = vpush %v910_v40  ;;  %v945_v41 = vrot.slane %v944_v39, 1 }
 0x38c   :  { %v946_v42 = vadd.f32 %v945_v41, %v944_v39 }
 0x38e   :  { %1084 = vpush %v946_v42 }
 0x3b5   :  { %s1079_s5 = spop %1078 }
 0x3b6   :  { %s126_s8 = smul.f32 0.125, %s1079_s5 }
 0x3b8   :  { %s1081_s3 = spop %1080 }
 0x3b9   :  { %s142_s24 = smul.f32 0.125, %s1081_s3 }
 0x3bb   :  { %s1083_s9 = spop %1082  ;;  %s143_s10 = sadd.f32 %s142_s24, %s126_s8 }
 0x3bc   :  { %s912_s11 = smul.f32 0.00390625, %s1083_s9 }
 0x3bd   :  { %s144_s14 = smul.f32 0.5, %s143_s10 }
 0x3bf   :  { %s1085_s12 = spop %1084  ;;  %s951_s0 = smul.f32 0.6, %s144_s14 }
 0x3c0   :  { %s948_s13 = smul.f32 0.00390625, %s1085_s12 }
 0x3c2   :  { %s949_s15 = sadd.f32 %s948_s13, %s912_s11 }
 0x3c4   :  { %s950_s16 = smul.f32 0.5, %s949_s15 }
 0x3c6   :  { %s952_s17 = smul.f32 0.4, %s950_s16  ;;  %957 = sst [smem:[#allocation11 + $0x1]] %s950_s16 }
 0x3c8   :  { %s953_s18 = sadd.f32 %s952_s17, %s951_s0 }
 0x3ca   :  { %955 = sst [smem:[#allocation11]] %s953_s18 }
 0x3cb   :  { %1387 = shalt.err (!%p1384_p0)
}
 0x3cc   :  { %s1403_s27 = smov [#allocation11]  }
 0x3cd   :  { %965 = dma.smem_to_hbm %s1403_s27, 16, %s1554_s6, [#allocation4]  }
 0x3ce   :  { %1394 = dma.done.wait [#allocation4], 16  }
 0x3cf   :  { %1395 = vsyncadd [#allocation4], 4294967280 }
 0x3d0   :  { %969 = sfence }
 0x3d1   :  { %970 = vsyncpa [#allocation3], 1 }
 0x3d2   :  { %971 = vsyncpa [#allocation6], 1 }
 0x3d3   :  { %972 = vsyncpa [#allocation9], 1 }
 0x3d4   :  { %973 = vsyncpa [#allocation4], 1 }

</bundles_post_ra>
